<compile_context>
chip_gen: v7x
topology: tpu7x:2x2x1
jax: 0.10.0
libtpu: 0.0.40
codegen_flags: <defaults>
</compile_context>

<pallas_src>
import functools
import math

import jax
import jax.numpy as jnp
from jax.experimental import pallas as pl
from jax.experimental.pallas import tpu as pltpu


# ---------------------------------------------------------------------------
# Per-generation VMEM budget
# ---------------------------------------------------------------------------

def _vmem_limit_bytes():
    try:
        info = pltpu.get_tpu_info()
        cap = getattr(info, "vmem_capacity_bytes", None)
        if cap:
            # 3/4 of physical VMEM, clamped to a sane range.
            return int(min(max(cap * 3 // 4, 32 * 1024 * 1024),
                           112 * 1024 * 1024))
    except Exception:
        pass
    return 48 * 1024 * 1024   # safe default (fits v7x's 64 MiB)


_VMEM_LIMIT = _vmem_limit_bytes()

# Tile targets (largest that comfortably fit VMEM; see review items 3-5, 7).
_TM_GEMM = 512     # rows per GEMM step (amortizes MRF drain on v5e)
_TK_GEMM = 1024    # reduction tile (fewer K steps / acc writebacks)
_TN_GEMM = 1024    # covers full padded cout -> A streamed once
_TM_EPI = 1024     # BN/act/residual epilogue tiles (streaming kernel)
_TN_EPI = 1024


# ---------------------------------------------------------------------------
# Small helpers (tiling / padding)
# ---------------------------------------------------------------------------

def _round_up(x, m):
    return ((x + m - 1) // m) * m


def _pick_tile(dim, target, align):
    """Return (tile, padded_dim): tile % align == 0 and tile | padded_dim."""
    d = _round_up(dim, align)
    if d <= target:
        return d, d
    for t in range(target, align - 1, -align):
        if d % t == 0:
            return t, d
    return target, _round_up(d, target)


def _pad2d(x, rows, cols):
    r, c = x.shape
    if r == rows and c == cols:
        return x
    return jnp.pad(x, ((0, rows - r), (0, cols - c)))


# ---------------------------------------------------------------------------
# Pallas kernels
# ---------------------------------------------------------------------------

def _make_gemm_kernel(has_bias: bool, compute_stats: bool):
    """Tiled GEMM (bf16 x bf16 -> f32 accumulate) with VMEM accumulator.

    Optionally adds a bias row at writeback and/or emits per-M-tile partial
    per-channel sum / sum-of-squares (for decoupled train-mode BN).  The
    partial-stats formulation is iteration-order independent and keeps every
    grid axis except K embarrassingly parallel (megacore-friendly).
    """

    def kernel(*refs):
        i = 0
        a_ref = refs[i]; i += 1
        b_ref = refs[i]; i += 1
        bias_ref = None
        if has_bias:
            bias_ref = refs[i]; i += 1
        z_ref = refs[i]; i += 1
        sum_ref = sq_ref = None
        if compute_stats:
            sum_ref, sq_ref = refs[i], refs[i + 1]; i += 2
        acc_ref = refs[i]

        k = pl.program_id(2)
        nk = pl.num_programs(2)

        @pl.when(k == 0)
        def _():
            acc_ref[...] = jnp.zeros_like(acc_ref)

        # MXU hot path: bf16 operands, f32 accumulate.
        acc_ref[...] += jnp.dot(a_ref[...], b_ref[...],
                                preferred_element_type=jnp.float32)

        @pl.when(k == nk - 1)
        def _():
            z = acc_ref[...]
            if has_bias:
                z = z + bias_ref[...]
            z_ref[...] = z.astype(z_ref.dtype)
            if compute_stats:
                # Per-channel partial sums over this M tile in f32 (padded
                # rows are exactly zero, so they do not perturb the stats).
                sum_ref[...] = jnp.sum(z, axis=0, keepdims=True)
                sq_ref[...] = jnp.sum(z * z, axis=0, keepdims=True)

    return kernel


def _make_bn_kernel(has_res: bool, inv_m: float):
    """Fused BN-normalize (train-mode stats) + LeakyReLU + optional residual.

    Reduces the (small) per-M-tile stat partials in-kernel.  Variance uses
    E[z^2]-E[z]^2 in f32 with a clamp at 0; acceptable here since z is the
    output of a zero-mean-initialised conv, but a centered two-pass would be
    safer for strongly offset channels.
    """

    def kernel(*refs):
        z_ref, sum_ref, sq_ref, g_ref, bt_ref = refs[:5]
        i = 5
        r_ref = None
        if has_res:
            r_ref = refs[i]; i += 1
        o_ref = refs[i]

        z = z_ref[...].astype(jnp.float32)
        s = jnp.sum(sum_ref[...], axis=0, keepdims=True)
        sq = jnp.sum(sq_ref[...], axis=0, keepdims=True)
        mean = s * inv_m
        var = jnp.maximum(sq * inv_m - mean * mean, 0.0)
        y = (z - mean) * jax.lax.rsqrt(var + 1e-5)     # EUP rsqrt, eps=1e-5
        y = y * g_ref[...] + bt_ref[...]
        y = jnp.where(y > 0, y, 0.01 * y)              # LeakyReLU(0.01) = torch default
        if has_res:
            y = y + r_ref[...].astype(jnp.float32)
        o_ref[...] = y.astype(o_ref.dtype)

    return kernel


def _avgpool_kernel(x_ref, o_ref):
    # (N, H*W, tc) -> (N, tc): AdaptiveAvgPool2d((1,1)) + flatten (f32 mean).
    o_ref[...] = jnp.mean(x_ref[...].astype(jnp.float32), axis=1)


# ---------------------------------------------------------------------------
# Pallas wrappers
# ---------------------------------------------------------------------------

def _gemm(a, b, bias=None, compute_stats=False, out_dtype=jnp.bfloat16):
    """a:(M,K) bf16 @ b:(K,N) bf16, f32 accumulate, tiled over (N, M, K)."""
    M, K = a.shape
    Kb, N = b.shape
    assert K == Kb
    tm, _ = _pick_tile(M, _TM_GEMM, 16)
    tk, _ = _pick_tile(K, _TK_GEMM, 128)
    tn, _ = _pick_tile(N, _TN_GEMM, 128)
    assert M % tm == 0 and K % tk == 0 and N % tn == 0
    gm, gk, gn = M // tm, K // tk, N // tn

    in_specs = [pl.BlockSpec((tm, tk), lambda n, m, k: (m, k)),
                pl.BlockSpec((tk, tn), lambda n, m, k: (k, n))]
    args = [a, b]
    if bias is not None:
        in_specs.append(pl.BlockSpec((1, tn), lambda n, m, k: (0, n)))
        args.append(bias)

    z_shape = jax.ShapeDtypeStruct((M, N), out_dtype)
    z_spec = pl.BlockSpec((tm, tn), lambda n, m, k: (m, n))
    scratch = [pltpu.VMEM((tm, tn), jnp.float32)]

    if compute_stats:
        stat_shape = jax.ShapeDtypeStruct((gm, N), jnp.float32)
        stat_spec = pl.BlockSpec((1, tn), lambda n, m, k: (m, n))
        out_shape = (z_shape, stat_shape, stat_shape)
        out_specs = (z_spec, stat_spec, stat_spec)
    else:
        out_shape = z_shape
        out_specs = z_spec

    return pl.pallas_call(
        _make_gemm_kernel(bias is not None, compute_stats),
        out_shape=out_shape,
        grid=(gn, gm, gk),
        in_specs=in_specs,
        out_specs=out_specs,
        scratch_shapes=scratch,
        compiler_params=pltpu.CompilerParams(
            dimension_semantics=("parallel", "parallel", "arbitrary"),
            vmem_limit_bytes=_VMEM_LIMIT),
    )(*args)


def _bn_act_res(z, col_sum, col_sq, gamma, beta, residual, m_real):
    """Normalize with batch stats, scale/shift, LeakyReLU, optional residual."""
    M, N = z.shape
    G = col_sum.shape[0]
    tm, _ = _pick_tile(M, _TM_EPI, 16)
    tn, _ = _pick_tile(N, _TN_EPI, 128)
    gm, gn = M // tm, N // tn

    tile_spec = pl.BlockSpec((tm, tn), lambda i, j: (i, j))
    stat_spec = pl.BlockSpec((G, tn), lambda i, j: (0, j))
    row_spec = pl.BlockSpec((1, tn), lambda i, j: (0, j))
    in_specs = [tile_spec, stat_spec, stat_spec, row_spec, row_spec]
    args = [z, col_sum, col_sq, gamma, beta]
    if residual is not None:
        in_specs.append(pl.BlockSpec((tm, tn), lambda i, j: (i, j)))
        args.append(residual)

    return pl.pallas_call(
        _make_bn_kernel(residual is not None, 1.0 / float(m_real)),
        out_shape=jax.ShapeDtypeStruct((M, N), jnp.bfloat16),
        grid=(gm, gn),
        in_specs=in_specs,
        out_specs=tile_spec,
        compiler_params=pltpu.CompilerParams(
            dimension_semantics=("parallel", "parallel"),
            vmem_limit_bytes=_VMEM_LIMIT),
    )(*args)


@jax.jit
def avgpool_flatten(x):
    """(N, H, W, C) -> (N, C) spatial mean, tiled over lane-dense C."""
    n, h, w, c = x.shape
    x3 = x.reshape(n, h * w, c)
    tc, c_pad = _pick_tile(c, 1024, 128)
    if c_pad != c:
        x3 = jnp.pad(x3, ((0, 0), (0, 0), (0, c_pad - c)))
    out = pl.pallas_call(
        _avgpool_kernel,
        out_shape=jax.ShapeDtypeStruct((n, c_pad), jnp.float32),
        grid=(c_pad // tc,),
        in_specs=[pl.BlockSpec((n, h * w, tc), lambda j: (0, 0, j))],
        out_specs=pl.BlockSpec((n, tc), lambda j: (0, j)),
        compiler_params=pltpu.CompilerParams(
            dimension_semantics=("parallel",),
            vmem_limit_bytes=_VMEM_LIMIT),
    )(x3)
    return out[:, :c]


# ---------------------------------------------------------------------------
# Conv / linear glue (im2col in bf16 + padding to lane-dense tiles)
# ---------------------------------------------------------------------------

def _im2col(x, k, stride, pad):
    # x: (N, H, W, C)  ->  (N*Ho*Wo, k*k*C), Ho, Wo
    n, h, w, c = x.shape
    xp = jnp.pad(x, ((0, 0), (pad, pad), (pad, pad), (0, 0)))
    ho = (h + 2 * pad - k) // stride + 1
    wo = (w + 2 * pad - k) // stride + 1
    cols = []
    for kh in range(k):
        for kw in range(k):
            cols.append(xp[:, kh:kh + stride * (ho - 1) + 1:stride,
                              kw:kw + stride * (wo - 1) + 1:stride, :])
    patches = jnp.concatenate(cols, axis=-1)
    return patches.reshape(n * ho * wo, k * k * c), ho, wo


@functools.partial(jax.jit, static_argnames=("k", "stride", "pad"))
def conv_block(x, w, bias, gamma, beta, residual, *, k, stride, pad):
    """Conv2d [+ train-mode BN + LeakyReLU [+ residual]] in NHWC, bf16 out.

    `bias` / `gamma` / `beta` / `residual` may be None.  DBL (conv+BN) layers
    carry no conv bias: it cancels exactly under train-mode BatchNorm.
    """
    n, h, wd, cin = x.shape
    cout = w.shape[-1]
    bn = gamma is not None

    x_b = x.astype(jnp.bfloat16)            # no-op when the input is already bf16
    if k == 1 and stride == 1 and pad == 0:
        a = x_b.reshape(n * h * wd, cin)
        ho, wo = h, wd
    else:
        a, ho, wo = _im2col(x_b, k, stride, pad)
    m_real = n * ho * wo
    kdim = a.shape[1]

    _, m_pad = _pick_tile(m_real, _TM_GEMM, 16)
    _, k_pad = _pick_tile(kdim, _TK_GEMM, 128)
    _, n_pad = _pick_tile(cout, _TN_GEMM, 128)

    a_p = _pad2d(a, m_pad, k_pad)
    w_p = _pad2d(w.reshape(kdim, cout), k_pad, n_pad).astype(jnp.bfloat16)

    if bn:
        z, s, sq = _gemm(a_p, w_p, bias=None, compute_stats=True,
                         out_dtype=jnp.bfloat16)
        g_p = _pad2d(gamma.reshape(1, cout), 1, n_pad)
        bt_p = _pad2d(beta.reshape(1, cout), 1, n_pad)
        r_p = None
        if residual is not None:
            r_p = _pad2d(residual.astype(jnp.bfloat16).reshape(m_real, cout),
                         m_pad, n_pad)
        y = _bn_act_res(z, s, sq, g_p, bt_p, r_p, m_real)
    else:
        b_p = _pad2d(bias.reshape(1, cout), 1, n_pad)
        y = _gemm(a_p, w_p, bias=b_p, compute_stats=False,
                  out_dtype=jnp.bfloat16)

    return y[:m_real, :cout].reshape(n, ho, wo, cout)


@jax.jit
def linear_layer(x, w, bias):
    m_real, cin = x.shape
    cout = w.shape[-1]
    _, m_pad = _pick_tile(m_real, _TM_GEMM, 16)
    _, k_pad = _pick_tile(cin, _TK_GEMM, 128)
    _, n_pad = _pick_tile(cout, _TN_GEMM, 128)
    a_p = _pad2d(x.astype(jnp.bfloat16), m_pad, k_pad)
    w_p = _pad2d(w, k_pad, n_pad).astype(jnp.bfloat16)
    b_p = _pad2d(bias.reshape(1, cout), 1, n_pad)
    y = _gemm(a_p, w_p, bias=b_p, compute_stats=False, out_dtype=jnp.float32)
    return y[:m_real, :cout]


def resblock(x, p1, p2):
    h = conv_block(x, p1["w"], None, p1["gamma"], p1["beta"], None,
                   k=1, stride=1, pad=0)
    return conv_block(h, p2["w"], None, p2["gamma"], p2["beta"], x,
                      k=3, stride=1, pad=1)


# ---------------------------------------------------------------------------
# Parameter construction (mirrors Darknet53.__init__ shapes)
# ---------------------------------------------------------------------------

def build_params(key, num_classes=5):
    keys = iter(jax.random.split(key, 256))

    def conv_p(cin, cout, k):
        w = jax.random.normal(next(keys), (k, k, cin, cout), jnp.float32)
        w = w / math.sqrt(k * k * cin)
        b = jax.random.normal(next(keys), (cout,), jnp.float32) * 0.01
        return {"w": w, "b": b}

    def dbl_p(cin, cout, k):
        # Conv bias omitted: cancelled exactly by train-mode BatchNorm mean.
        w = jax.random.normal(next(keys), (k, k, cin, cout), jnp.float32)
        w = w / math.sqrt(k * k * cin)
        return {"w": w,
                "gamma": jnp.ones((cout,), jnp.float32),   # BN default init
                "beta": jnp.zeros((cout,), jnp.float32)}

    def res_stage(nblk, cin, cmid):
        return {"type": "res",
                "blocks": [(dbl_p(cin, cmid, 1), dbl_p(cmid, cin, 3))
                           for _ in range(nblk)]}

    features = [
        {"type": "conv", "stride": 1, "p": conv_p(3, 32, 3)},
        {"type": "conv", "stride": 2, "p": conv_p(32, 64, 3)},
        res_stage(1, 64, 32),
        {"type": "conv", "stride": 2, "p": conv_p(64, 128, 3)},
        res_stage(2, 128, 64),
        {"type": "conv", "stride": 2, "p": conv_p(128, 256, 3)},
        res_stage(8, 256, 128),
        {"type": "conv", "stride": 2, "p": conv_p(256, 512, 3)},
        res_stage(8, 512, 256),
        {"type": "conv", "stride": 2, "p": conv_p(512, 1024, 3)},
        res_stage(4, 1024, 512),
    ]

    def linear_p(cin, cout):
        w = jax.random.normal(next(keys), (cin, cout), jnp.float32) / math.sqrt(cin)
        b = jax.random.normal(next(keys), (cout,), jnp.float32) * 0.01
        return {"w": w, "b": b}

    return {"features": features,
            "fc1": linear_p(1024, 4096),
            "fc2": linear_p(4096, num_classes)}


# ---------------------------------------------------------------------------
# Full forward pass
# ---------------------------------------------------------------------------

def darknet53_forward(params, x_nchw):
    x = jnp.transpose(x_nchw, (0, 2, 3, 1))              # NCHW -> NHWC
    for layer in params["features"]:
        if layer["type"] == "conv":
            p = layer["p"]
            x = conv_block(x, p["w"], p["b"], None, None, None,
                           k=3, stride=layer["stride"], pad=1)
        else:
            for (p1, p2) in layer["blocks"]:
                x = resblock(x, p1, p2)
    x = avgpool_flatten(x)                                # (N, 1024) f32
    x = linear_layer(x, params["fc1"]["w"], params["fc1"]["b"])   # 1024->4096
    x = linear_layer(x, params["fc2"]["w"], params["fc2"]["b"])   # 4096->num_classes
    return x


# ---------------------------------------------------------------------------
# Main
# ---------------------------------------------------------------------------

if __name__ == "__main__":
    key = jax.random.PRNGKey(0)
    pkey, xkey = jax.random.split(key)

    params = build_params(pkey, num_classes=5)
    # Small input consistent with the module (NCHW, 3 input channels).
    x = jax.random.normal(xkey, (2, 3, 16, 16), jnp.float32)

    out = darknet53_forward(params, x)
    out = jax.block_until_ready(out)
    assert out.shape == (2, 5), out.shape
    assert bool(jnp.all(jnp.isfinite(out)))
    print("KERNEL_OK")
</pallas_src>

<mosaic_0001>
module attributes {stable_mosaic.version = 11 : i64} {
  func.func @kernel(%arg0: i32, %arg1: i32, %arg2: i32, %arg3: memref<512x128xbf16, #tpu.memory_space<vmem>>, %arg4: memref<128x128xbf16, #tpu.memory_space<vmem>>, %arg5: memref<1x128xf32, #tpu.memory_space<vmem>>, %arg6: memref<512x128xbf16, #tpu.memory_space<vmem>>, %arg7: memref<512x128xf32, #tpu.memory_space<vmem>>) attributes {dimension_semantics = [#tpu.dimension_semantics<parallel>, #tpu.dimension_semantics<parallel>, #tpu.dimension_semantics<arbitrary>], iteration_bounds = array<i64: 1, 1, 1>, scalar_prefetch = 0 : i64, scratch_operands = 1 : i64, tpu.core_type = #tpu.core_type<tc>, window_params = [{transform_indices = @transform_0, window_bounds = array<i64: 512, 128>}, {transform_indices = @transform_1, window_bounds = array<i64: 128, 128>}, {transform_indices = @transform_2, window_bounds = array<i64: 1, 128>}, {transform_indices = @transform_3, window_bounds = array<i64: 512, 128>}]} {
    %c0_i32 = arith.constant 0 : i32
    %0 = arith.cmpi eq, %arg2, %c0_i32 : i32
    %1 = arith.extui %0 : i1 to i32
    %c0_i32_0 = arith.constant 0 : i32
    %2 = arith.cmpi ne, %1, %c0_i32_0 : i32
    scf.if %2 {
      %cst_10 = arith.constant 0.000000e+00 : f32
      %12 = vector.broadcast %cst_10 : f32 to vector<512x128xf32>
      %c0_11 = arith.constant 0 : index
      %c0_12 = arith.constant 0 : index
      %13 = vector.load %arg7[%c0_11, %c0_12] : memref<512x128xf32, #tpu.memory_space<vmem>>, vector<512x128xf32>
      tpu.vector_store %arg7[%c0_11, %c0_12], %12 {strides = array<i32>} : memref<512x128xf32, #tpu.memory_space<vmem>>, vector<512x128xf32>,
    } else {
    }
    %c0 = arith.constant 0 : index
    %c0_1 = arith.constant 0 : index
    %3 = vector.load %arg7[%c0, %c0_1] : memref<512x128xf32, #tpu.memory_space<vmem>>, vector<512x128xf32>
    %c0_2 = arith.constant 0 : index
    %c0_3 = arith.constant 0 : index
    %4 = vector.load %arg3[%c0_2, %c0_3] : memref<512x128xbf16, #tpu.memory_space<vmem>>, vector<512x128xbf16>
    %c0_4 = arith.constant 0 : index
    %c0_5 = arith.constant 0 : index
    %5 = vector.load %arg4[%c0_4, %c0_5] : memref<128x128xbf16, #tpu.memory_space<vmem>>, vector<128x128xbf16>
    %cst = arith.constant dense<0.000000e+00> : vector<512x128xf32>
    %6 = tpu.matmul %4, %5, %cst {dimension_numbers = #tpu.dot_dimension_numbers<[1], [0], [0], [1], [0, 0, 1, 1], [], []>} : vector<512x128xbf16>, vector<128x128xbf16>, vector<512x128xf32> -> vector<512x128xf32>
    %7 = arith.addf %3, %6 : vector<512x128xf32>
    %c0_6 = arith.constant 0 : index
    %c0_7 = arith.constant 0 : index
    %8 = vector.load %arg7[%c0_6, %c0_7] : memref<512x128xf32, #tpu.memory_space<vmem>>, vector<512x128xf32>
    tpu.vector_store %arg7[%c0_6, %c0_7], %7 {strides = array<i32>} : memref<512x128xf32, #tpu.memory_space<vmem>>, vector<512x128xf32>,
    %c0_i32_8 = arith.constant 0 : i32
    %9 = arith.cmpi eq, %arg2, %c0_i32_8 : i32
    %10 = arith.extui %9 : i1 to i32
    %c0_i32_9 = arith.constant 0 : i32
    %11 = arith.cmpi ne, %10, %c0_i32_9 : i32
    scf.if %11 {
      %c0_10 = arith.constant 0 : index
      %c0_11 = arith.constant 0 : index
      %12 = vector.load %arg7[%c0_10, %c0_11] : memref<512x128xf32, #tpu.memory_space<vmem>>, vector<512x128xf32>
      %c0_12 = arith.constant 0 : index
      %c0_13 = arith.constant 0 : index
      %13 = vector.load %arg5[%c0_12, %c0_13] : memref<1x128xf32, #tpu.memory_space<vmem>>, vector<1x128xf32>
      %14 = vector.broadcast %13 : vector<1x128xf32> to vector<512x128xf32>
      %15 = arith.addf %12, %14 : vector<512x128xf32>
      %16 = arith.truncf %15 : vector<512x128xf32> to vector<512x128xbf16>
      %c0_14 = arith.constant 0 : index
      %c0_15 = arith.constant 0 : index
      %17 = vector.load %arg6[%c0_14, %c0_15] : memref<512x128xbf16, #tpu.memory_space<vmem>>, vector<512x128xbf16>
      tpu.vector_store %arg6[%c0_14, %c0_15], %16 {strides = array<i32>} : memref<512x128xbf16, #tpu.memory_space<vmem>>, vector<512x128xbf16>,
    } else {
    }
    return
  }
  func.func @transform_0(%arg0: i32, %arg1: i32, %arg2: i32) -> (i32, i32) {
    %c0_i32 = arith.constant 0 : i32
    return %arg1, %arg2 : i32, i32
  }
  func.func @transform_1(%arg0: i32, %arg1: i32, %arg2: i32) -> (i32, i32) {
    %c0_i32 = arith.constant 0 : i32
    return %arg2, %arg0 : i32, i32
  }
  func.func @transform_2(%arg0: i32, %arg1: i32, %arg2: i32) -> (i32, i32) {
    %c0_i32 = arith.constant 0 : i32
    %c0_i32_0 = arith.constant 0 : i32
    return %c0_i32, %arg0 : i32, i32
  }
  func.func @transform_3(%arg0: i32, %arg1: i32, %arg2: i32) -> (i32, i32) {
    %c0_i32 = arith.constant 0 : i32
    return %arg1, %arg0 : i32, i32
  }
}

</mosaic_0001>

<bundles_post_ra>
// kernel: conv_block.1
= control target key start
LH: loop header
LB: loop body
LE: loop exit
PB: predicated region body
PF: predicated region fallthrough
CT: control target
= control target key end

     0   :  { %s2146_s0 = inlined_call_operand.vmem [shape: bf16[512,128], index: 0, kind: input, shape index: {}]   ;;  %s2147_s1 = inlined_call_operand.vmem [shape: bf16[128,128], index: 1, kind: input, shape index: {}]   ;;  %s2148_s2 = inlined_call_operand.vmem [shape: f32[1,128], index: 2, kind: input, shape index: {}]   ;;  %s2149_s3 = inlined_call_operand.hbm [shape: bf16[512,128], index: 3, kind: output, shape index: {}]  }
   0x1   :  { %v1858_v0 = vld [vmem:[%s2147_s1] sm:$0xff]   ;;  %v1859_v1 = vld [vmem:[%s2147_s1 + $0x8] sm:$0xff]   ;;  %v1860_v2 = vld [vmem:[%s2147_s1 + $0x10] sm:$0xff]  }
   0x2   :  { %1759 = vmatprep.subr.bf16.mxu0 %v1858_v0  ;;  %1839 = vmatprep.subr.bf16.mxu1 %v1858_v0  ;;  %v1861_v3 = vld [vmem:[%s2147_s1 + $0x18] sm:$0xff]   ;;  %v1866_v4 = vld [vmem:[%s2146_s0] sm:$0xff]   ;;  %v1863_v7 = vld [vmem:[%s2147_s1 + $0x28] sm:$0xff]  }
   0x3   :  { %1760 = vmatpush3.bf16.msra.mxu0 %v1858_v0  ;;  %1847 = vmatpush3.bf16.msra.mxu1 %v1858_v0  ;;  %v1867_v5 = vld [vmem:[%s2146_s0 + $0x80] sm:$0xff]   ;;  %v1864_v8 = vld [vmem:[%s2147_s1 + $0x30] sm:$0xff]   ;;  %v1865_v9 = vld [vmem:[%s2147_s1 + $0x38] sm:$0xff]  }
   0x4   :  { %1761 = vmatprep.subr.bf16.mxu0 %v1859_v1  ;;  %1840 = vmatprep.subr.bf16.mxu1 %v1859_v1  ;;  %v1862_v6 = vld [vmem:[%s2147_s1 + $0x20] sm:$0xff]   ;;  %v1868_v10 = vld [vmem:[%s2146_s0 + $0x8] sm:$0xff]   ;;  %v1870_v12 = vld [vmem:[%s2146_s0 + $0x10] sm:$0xff]  }
   0x5   :  { %1775 = vmatprep.mubr.bf16.mxu0 %v1866_v4  ;;  %1807 = vmatprep.mubr.bf16.mxu1 %v1867_v5  ;;  %v1869_v11 = vld [vmem:[%s2146_s0 + $0x88] sm:$0xff]   ;;  %v1871_v13 = vld [vmem:[%s2146_s0 + $0x90] sm:$0xff]   ;;  %v1872_v14 = vld [vmem:[%s2146_s0 + $0x18] sm:$0xff]  }
   0x6   :  { %v1873_v15 = vld [vmem:[%s2146_s0 + $0x98] sm:$0xff]   ;;  %v1874_v16 = vld [vmem:[%s2146_s0 + $0x20] sm:$0xff]  }
   0x7   :  { %1762 = vmatpush3.bf16.msra.mxu0 %v1859_v1  ;;  %1848 = vmatpush3.bf16.msra.mxu1 %v1859_v1  ;;  %v1875_v17 = vld [vmem:[%s2146_s0 + $0xa0] sm:$0xff]  }
   0x8   :  { %1763 = vmatprep.subr.bf16.mxu0 %v1860_v2  ;;  %1841 = vmatprep.subr.bf16.mxu1 %v1860_v2 }
   0xb   :  { %1764 = vmatpush3.bf16.msra.mxu0 %v1860_v2  ;;  %1849 = vmatpush3.bf16.msra.mxu1 %v1860_v2 }
   0xc   :  { %1765 = vmatprep.subr.bf16.mxu0 %v1861_v3  ;;  %1842 = vmatprep.subr.bf16.mxu1 %v1861_v3 }
   0xf   :  { %1766 = vmatpush3.bf16.msra.mxu0 %v1861_v3  ;;  %1850 = vmatpush3.bf16.msra.mxu1 %v1861_v3 }
  0x10   :  { %1767 = vmatprep.subr.bf16.mxu0 %v1862_v6  ;;  %1843 = vmatprep.subr.bf16.mxu1 %v1862_v6 }
  0x13   :  { %1768 = vmatpush3.bf16.msra.mxu0 %v1862_v6  ;;  %1851 = vmatpush3.bf16.msra.mxu1 %v1862_v6 }
  0x14   :  { %1769 = vmatprep.subr.bf16.mxu0 %v1863_v7  ;;  %1844 = vmatprep.subr.bf16.mxu1 %v1863_v7 }
  0x17   :  { %1770 = vmatpush3.bf16.msra.mxu0 %v1863_v7  ;;  %1852 = vmatpush3.bf16.msra.mxu1 %v1863_v7 }
  0x18   :  { %1771 = vmatprep.subr.bf16.mxu0 %v1864_v8  ;;  %1845 = vmatprep.subr.bf16.mxu1 %v1864_v8 }
  0x1b   :  { %1772 = vmatpush3.bf16.msra.mxu0 %v1864_v8  ;;  %1853 = vmatpush3.bf16.msra.mxu1 %v1864_v8 }
  0x1c   :  { %1773 = vmatprep.subr.bf16.mxu0 %v1865_v9  ;;  %1846 = vmatprep.subr.bf16.mxu1 %v1865_v9 }
  0x1f   :  { %1774 = vmatpush3.bf16.msra.mxu0 %v1865_v9  ;;  %1854 = vmatpush3.bf16.msra.mxu1 %v1865_v9 }
  0x22   :  { %1776 = vmatmul.mubr.bf16.vlgmr.msra.gmra.mrb[0].mxu0 %v1868_v10  ;;  %1808 = vmatmul.mubr.bf16.vlgmr.msra.gmra.mrb[0].mxu1 %v1869_v11 }
  0x23   :  { %1779 = vmatprep.mubr.bf16.mxu0 %v1870_v12  ;;  %1811 = vmatprep.mubr.bf16.mxu1 %v1871_v13 }
  0x24   :  { %8 = vsyncpa [#allocation4], 0  ;;  %v1876_v18 = vld [vmem:[%s2146_s0 + $0x28] sm:$0xff]   ;;  %v1878_v20 = vld [vmem:[%s2146_s0 + $0x30] sm:$0xff]  }
  0x25   :  { %v1877_v19 = vld [vmem:[%s2146_s0 + $0xa8] sm:$0xff]   ;;  %v1879_v21 = vld [vmem:[%s2146_s0 + $0xb0] sm:$0xff]   ;;  %v1880_v22 = vld [vmem:[%s2146_s0 + $0x38] sm:$0xff]  }
  0x26   :  { %v1881_v23 = vld [vmem:[%s2146_s0 + $0xb8] sm:$0xff]   ;;  %v1882_v24 = vld [vmem:[%s2146_s0 + $0x40] sm:$0xff]   ;;  %v1884_v26 = vld [vmem:[%s2146_s0 + $0x48] sm:$0xff]  }
  0x27   :  { %v1883_v25 = vld [vmem:[%s2146_s0 + $0xc0] sm:$0xff]   ;;  %v1885_v27 = vld [vmem:[%s2146_s0 + $0xc8] sm:$0xff]   ;;  %v1886_v28 = vld [vmem:[%s2146_s0 + $0x50] sm:$0xff]  }
  0x28   :  { %v1887_v29 = vld [vmem:[%s2146_s0 + $0xd0] sm:$0xff]   ;;  %v1888_v30 = vld [vmem:[%s2146_s0 + $0x58] sm:$0xff]   ;;  %v1890_v32 = vld [vmem:[%s2146_s0 + $0x60] sm:$0xff]  }
  0x29   :  { %v1889_v31 = vld [vmem:[%s2146_s0 + $0xd8] sm:$0xff]   ;;  %v1891_v33 = vld [vmem:[%s2146_s0 + $0xe0] sm:$0xff]   ;;  %v1892_v34 = vld [vmem:[%s2146_s0 + $0x68] sm:$0xff]  }
  0x2a   :  { %1780 = vmatmul.mubr.bf16.gmra.mrb[4].mxu0 %v1872_v14  ;;  %1812 = vmatmul.mubr.bf16.gmra.mrb[4].mxu1 %v1873_v15  ;;  %v1893_v35 = vld [vmem:[%s2146_s0 + $0xe8] sm:$0xff]   ;;  %v1894_v36 = vld [vmem:[%s2146_s0 + $0x70] sm:$0xff]   ;;  %v1896_v38 = vld [vmem:[%s2146_s0 + $0x78] sm:$0xff]  }
  0x2b   :  { %1783 = vmatprep.mubr.bf16.mxu0 %v1874_v16  ;;  %1815 = vmatprep.mubr.bf16.mxu1 %v1875_v17  ;;  %v1895_v37 = vld [vmem:[%s2146_s0 + $0xf0] sm:$0xff]   ;;  %v1897_v39 = vld [vmem:[%s2146_s0 + $0xf8] sm:$0xff]   ;;  %v2068_v41 = vld [vmem:[%s2148_s2] ss:$0 sm:$0xff]  ;;  %s1922_s0 = smov [#allocation3]  }
  0x2c   :  { %s1348_s2 = sshll.u32 %s1922_s0, 4  ;;  %s1349_s2 = int_to_ptr.vmem [resolvable:$true] %s1348_s2 }
  0x2d   :  { %s1898_s11 = scalar_lea.vmem %s1349_s2, 4096  ;;  %p1903_p1 = scmp.lt.s32.totalorder %s1349_s2, %s1349_s2 }
  0x2e   :  { %p1899_p0 = scmp.ne.s32.totalorder %s1349_s2, %s1898_s11  ;;  %p1904_p2 = scmp.lt.s32.totalorder %s1898_s11, %s1898_s11 }
  0x30   :  { %p1905_p3 = por %p1904_p2, %p1903_p1 }
  0x32   :  { %1784 = vmatmul.mubr.bf16.gmra.mrb[8].mxu0 %v1876_v18  ;;  %1816 = vmatmul.mubr.bf16.gmra.mrb[8].mxu1 %v1877_v19  ;;  %p1906_p4 = pnand %p1905_p3, %p1899_p0 }
  0x33   :  { %1787 = vmatprep.mubr.bf16.mxu0 %v1878_v20  ;;  %1819 = vmatprep.mubr.bf16.mxu1 %v1879_v21 }
  0x3a   :  { %1788 = vmatmul.mubr.bf16.gmra.mrb[12].mxu0 %v1880_v22  ;;  %1820 = vmatmul.mubr.bf16.gmra.mrb[12].mxu1 %v1881_v23 }
  0x3b   :  { %1791 = vmatprep.mubr.bf16.mxu0 %v1882_v24  ;;  %1823 = vmatprep.mubr.bf16.mxu1 %v1883_v25 }
  0x42   :  { %1792 = vmatmul.mubr.bf16.gmra.mrb[16].mxu0 %v1884_v26  ;;  %1824 = vmatmul.mubr.bf16.gmra.mrb[16].mxu1 %v1885_v27 }
  0x43   :  { %1795 = vmatprep.mubr.bf16.mxu0 %v1886_v28  ;;  %1827 = vmatprep.mubr.bf16.mxu1 %v1887_v29 }
  0x4a   :  { %1796 = vmatmul.mubr.bf16.gmra.mrb[20].mxu0 %v1888_v30  ;;  %1828 = vmatmul.mubr.bf16.gmra.mrb[20].mxu1 %v1889_v31 }
  0x4b   :  { %1799 = vmatprep.mubr.bf16.mxu0 %v1890_v32  ;;  %1831 = vmatprep.mubr.bf16.mxu1 %v1891_v33 }
  0x52   :  { %1800 = vmatmul.mubr.bf16.gmra.mrb[24].mxu0 %v1892_v34  ;;  %1832 = vmatmul.mubr.bf16.gmra.mrb[24].mxu1 %v1893_v35 }
  0x53   :  { %1803 = vmatprep.mubr.bf16.mxu0 %v1894_v36  ;;  %1835 = vmatprep.mubr.bf16.mxu1 %v1895_v37 }
  0x5a   :  { %1804 = vmatmul.mubr.bf16.gmra.mrb[28].mxu0 %v1896_v38  ;;  %1836 = vmatmul.mubr.bf16.gmra.mrb[28].mxu1 %v1897_v39 }
  0xf5   :  { %v1777_v40 = vpop.f32.mrb[0].mxu0  ;;  %v1809_v42 = vpop.f32.mrb[0].mxu1 }
  0xf6   :  { %v502_v43 = vpop.f32.mrb[1].mxu0  ;;  %v630_v44 = vpop.f32.mrb[1].mxu1  ;;  %v961_v47 = vadd.f32 %v1777_v40, %v2068_v41  ;;  %v993_v48 = vadd.f32 %v1809_v42, %v2068_v41 }
  0xf7   :  { %v1778_v45 = vpop.f32.mrb[2].mxu0  ;;  %v1810_v46 = vpop.f32.mrb[2].mxu1  ;;  %v959_v53 = vadd.f32 %v2068_v41, %v502_v43  ;;  %v991_v54 = vadd.f32 %v2068_v41, %v630_v44 }
  0xf8   :  { %v962_v49 = vadd.f32 %v1778_v45, %v2068_v41  ;;  %v994_v50 = vadd.f32 %v1810_v46, %v2068_v41  ;;  %v505_v51 = vpop.f32.mrb[3].mxu0  ;;  %v633_v52 = vpop.f32.mrb[3].mxu1 }
  0xf9   :  { %v960_v55 = vadd.f32 %v2068_v41, %v505_v51  ;;  %v992_v56 = vadd.f32 %v2068_v41, %v633_v52 }
  0xfa   :  { %v1536_v57 = vpack.c.bf16 %v962_v49, %v961_v47  ;;  %v1616_v58 = vpack.c.bf16 %v994_v50, %v993_v48 }
  0xfb   :  { %v1531_v59 = vpack.c.bf16 %v960_v55, %v959_v53  ;;  %v1611_v60 = vpack.c.bf16 %v992_v56, %v991_v54 }
  0xfc   :  { %1688 = vst [vmem:[#allocation3 + $0x8] sm:$0xff] %v1536_v57   ;;  %1704 = vst [vmem:[#allocation3 + $0x88] sm:$0xff] %v1616_v58  }
  0xfd   :  { %1532 = vst [vmem:[#allocation3] sm:$0xff] %v1531_v59   ;;  %1703 = vst [vmem:[#allocation3 + $0x80] sm:$0xff] %v1611_v60   ;;  %v1781_v61 = vpop.f32.mrb[4].mxu0  ;;  %v1813_v62 = vpop.f32.mrb[4].mxu1 }
  0xfe   :  { %v518_v63 = vpop.f32.mrb[5].mxu0  ;;  %v646_v0 = vpop.f32.mrb[5].mxu1  ;;  %v965_v3 = vadd.f32 %v1781_v61, %v2068_v41  ;;  %v997_v4 = vadd.f32 %v1813_v62, %v2068_v41 }
  0xff   :  { %v1782_v1 = vpop.f32.mrb[6].mxu0  ;;  %v1814_v2 = vpop.f32.mrb[6].mxu1  ;;  %v963_v9 = vadd.f32 %v2068_v41, %v518_v63  ;;  %v995_v10 = vadd.f32 %v2068_v41, %v646_v0 }
 0x100   :  { %v966_v5 = vadd.f32 %v1782_v1, %v2068_v41  ;;  %v998_v6 = vadd.f32 %v1814_v2, %v2068_v41  ;;  %v521_v7 = vpop.f32.mrb[7].mxu0  ;;  %v649_v8 = vpop.f32.mrb[7].mxu1 }
 0x101   :  { %v964_v11 = vadd.f32 %v2068_v41, %v521_v7  ;;  %v996_v12 = vadd.f32 %v2068_v41, %v649_v8 }
 0x102   :  { %v1546_v13 = vpack.c.bf16 %v966_v5, %v965_v3  ;;  %v1626_v14 = vpack.c.bf16 %v998_v6, %v997_v4 }
 0x103   :  { %v1541_v15 = vpack.c.bf16 %v964_v11, %v963_v9  ;;  %v1621_v16 = vpack.c.bf16 %v996_v12, %v995_v10 }
 0x104   :  { %1690 = vst [vmem:[#allocation3 + $0x18] sm:$0xff] %v1546_v13   ;;  %1706 = vst [vmem:[#allocation3 + $0x98] sm:$0xff] %v1626_v14  }
 0x105   :  { %1689 = vst [vmem:[#allocation3 + $0x10] sm:$0xff] %v1541_v15   ;;  %1705 = vst [vmem:[#allocation3 + $0x90] sm:$0xff] %v1621_v16   ;;  %v1785_v17 = vpop.f32.mrb[8].mxu0  ;;  %v1817_v18 = vpop.f32.mrb[8].mxu1 }
 0x106   :  { %v534_v19 = vpop.f32.mrb[9].mxu0  ;;  %v662_v20 = vpop.f32.mrb[9].mxu1  ;;  %v969_v23 = vadd.f32 %v1785_v17, %v2068_v41  ;;  %v1001_v24 = vadd.f32 %v1817_v18, %v2068_v41 }
 0x107   :  { %v1786_v21 = vpop.f32.mrb[10].mxu0  ;;  %v1818_v22 = vpop.f32.mrb[10].mxu1  ;;  %v967_v29 = vadd.f32 %v2068_v41, %v534_v19  ;;  %v999_v30 = vadd.f32 %v2068_v41, %v662_v20 }
 0x108   :  { %v970_v25 = vadd.f32 %v1786_v21, %v2068_v41  ;;  %v1002_v26 = vadd.f32 %v1818_v22, %v2068_v41  ;;  %v537_v27 = vpop.f32.mrb[11].mxu0  ;;  %v665_v28 = vpop.f32.mrb[11].mxu1 }
 0x109   :  { %v968_v31 = vadd.f32 %v2068_v41, %v537_v27  ;;  %v1000_v32 = vadd.f32 %v2068_v41, %v665_v28 }
 0x10a   :  { %v1556_v33 = vpack.c.bf16 %v970_v25, %v969_v23  ;;  %v1636_v34 = vpack.c.bf16 %v1002_v26, %v1001_v24 }
 0x10b   :  { %v1551_v35 = vpack.c.bf16 %v968_v31, %v967_v29  ;;  %v1631_v36 = vpack.c.bf16 %v1000_v32, %v999_v30 }
 0x10c   :  { %1692 = vst [vmem:[#allocation3 + $0x28] sm:$0xff] %v1556_v33   ;;  %1708 = vst [vmem:[#allocation3 + $0xa8] sm:$0xff] %v1636_v34  }
 0x10d   :  { %1691 = vst [vmem:[#allocation3 + $0x20] sm:$0xff] %v1551_v35   ;;  %1707 = vst [vmem:[#allocation3 + $0xa0] sm:$0xff] %v1631_v36   ;;  %v1789_v37 = vpop.f32.mrb[12].mxu0  ;;  %v1821_v38 = vpop.f32.mrb[12].mxu1 }
 0x10e   :  { %v550_v39 = vpop.f32.mrb[13].mxu0  ;;  %v678_v40 = vpop.f32.mrb[13].mxu1  ;;  %v973_v44 = vadd.f32 %v1789_v37, %v2068_v41  ;;  %v1005_v45 = vadd.f32 %v1821_v38, %v2068_v41 }
 0x10f   :  { %v1790_v42 = vpop.f32.mrb[14].mxu0  ;;  %v1822_v43 = vpop.f32.mrb[14].mxu1  ;;  %v971_v50 = vadd.f32 %v2068_v41, %v550_v39  ;;  %v1003_v51 = vadd.f32 %v2068_v41, %v678_v40 }
 0x110   :  { %v974_v46 = vadd.f32 %v1790_v42, %v2068_v41  ;;  %v1006_v47 = vadd.f32 %v1822_v43, %v2068_v41  ;;  %v553_v48 = vpop.f32.mrb[15].mxu0  ;;  %v681_v49 = vpop.f32.mrb[15].mxu1 }
 0x111   :  { %v972_v52 = vadd.f32 %v2068_v41, %v553_v48  ;;  %v1004_v53 = vadd.f32 %v2068_v41, %v681_v49 }
 0x112   :  { %v1566_v54 = vpack.c.bf16 %v974_v46, %v973_v44  ;;  %v1646_v55 = vpack.c.bf16 %v1006_v47, %v1005_v45 }
 0x113   :  { %v1561_v56 = vpack.c.bf16 %v972_v52, %v971_v50  ;;  %v1641_v57 = vpack.c.bf16 %v1004_v53, %v1003_v51 }
 0x114   :  { %1694 = vst [vmem:[#allocation3 + $0x38] sm:$0xff] %v1566_v54   ;;  %1710 = vst [vmem:[#allocation3 + $0xb8] sm:$0xff] %v1646_v55  }
 0x115   :  { %1693 = vst [vmem:[#allocation3 + $0x30] sm:$0xff] %v1561_v56   ;;  %1709 = vst [vmem:[#allocation3 + $0xb0] sm:$0xff] %v1641_v57   ;;  %v1793_v58 = vpop.f32.mrb[16].mxu0  ;;  %v1825_v59 = vpop.f32.mrb[16].mxu1 }
 0x116   :  { %v566_v60 = vpop.f32.mrb[17].mxu0  ;;  %v694_v61 = vpop.f32.mrb[17].mxu1  ;;  %v977_v0 = vadd.f32 %v1793_v58, %v2068_v41  ;;  %v1009_v1 = vadd.f32 %v1825_v59, %v2068_v41 }
 0x117   :  { %v1794_v62 = vpop.f32.mrb[18].mxu0  ;;  %v1826_v63 = vpop.f32.mrb[18].mxu1  ;;  %v975_v6 = vadd.f32 %v2068_v41, %v566_v60  ;;  %v1007_v7 = vadd.f32 %v2068_v41, %v694_v61 }
 0x118   :  { %v978_v2 = vadd.f32 %v1794_v62, %v2068_v41  ;;  %v1010_v3 = vadd.f32 %v1826_v63, %v2068_v41  ;;  %v569_v4 = vpop.f32.mrb[19].mxu0  ;;  %v697_v5 = vpop.f32.mrb[19].mxu1 }
 0x119   :  { %v976_v8 = vadd.f32 %v2068_v41, %v569_v4  ;;  %v1008_v9 = vadd.f32 %v2068_v41, %v697_v5 }
 0x11a   :  { %v1576_v10 = vpack.c.bf16 %v978_v2, %v977_v0  ;;  %v1656_v11 = vpack.c.bf16 %v1010_v3, %v1009_v1 }
 0x11b   :  { %v1571_v12 = vpack.c.bf16 %v976_v8, %v975_v6  ;;  %v1651_v13 = vpack.c.bf16 %v1008_v9, %v1007_v7 }
 0x11c   :  { %1696 = vst [vmem:[#allocation3 + $0x48] sm:$0xff] %v1576_v10   ;;  %1712 = vst [vmem:[#allocation3 + $0xc8] sm:$0xff] %v1656_v11  }
 0x11d   :  { %1695 = vst [vmem:[#allocation3 + $0x40] sm:$0xff] %v1571_v12   ;;  %1711 = vst [vmem:[#allocation3 + $0xc0] sm:$0xff] %v1651_v13   ;;  %v1797_v14 = vpop.f32.mrb[20].mxu0  ;;  %v1829_v15 = vpop.f32.mrb[20].mxu1 }
 0x11e   :  { %v582_v16 = vpop.f32.mrb[21].mxu0  ;;  %v710_v17 = vpop.f32.mrb[21].mxu1  ;;  %v981_v20 = vadd.f32 %v1797_v14, %v2068_v41  ;;  %v1013_v21 = vadd.f32 %v1829_v15, %v2068_v41 }
 0x11f   :  { %v1798_v18 = vpop.f32.mrb[22].mxu0  ;;  %v1830_v19 = vpop.f32.mrb[22].mxu1  ;;  %v979_v26 = vadd.f32 %v2068_v41, %v582_v16  ;;  %v1011_v27 = vadd.f32 %v2068_v41, %v710_v17 }
 0x120   :  { %v982_v22 = vadd.f32 %v1798_v18, %v2068_v41  ;;  %v1014_v23 = vadd.f32 %v1830_v19, %v2068_v41  ;;  %v585_v24 = vpop.f32.mrb[23].mxu0  ;;  %v713_v25 = vpop.f32.mrb[23].mxu1 }
 0x121   :  { %v980_v28 = vadd.f32 %v2068_v41, %v585_v24  ;;  %v1012_v29 = vadd.f32 %v2068_v41, %v713_v25 }
 0x122   :  { %v1586_v30 = vpack.c.bf16 %v982_v22, %v981_v20  ;;  %v1666_v31 = vpack.c.bf16 %v1014_v23, %v1013_v21 }
 0x123   :  { %v1581_v32 = vpack.c.bf16 %v980_v28, %v979_v26  ;;  %v1661_v33 = vpack.c.bf16 %v1012_v29, %v1011_v27 }
 0x124   :  { %1698 = vst [vmem:[#allocation3 + $0x58] sm:$0xff] %v1586_v30   ;;  %1714 = vst [vmem:[#allocation3 + $0xd8] sm:$0xff] %v1666_v31  }
 0x125   :  { %1697 = vst [vmem:[#allocation3 + $0x50] sm:$0xff] %v1581_v32   ;;  %1713 = vst [vmem:[#allocation3 + $0xd0] sm:$0xff] %v1661_v33   ;;  %v1801_v34 = vpop.f32.mrb[24].mxu0  ;;  %v1833_v35 = vpop.f32.mrb[24].mxu1 }
 0x126   :  { %v598_v36 = vpop.f32.mrb[25].mxu0  ;;  %v726_v37 = vpop.f32.mrb[25].mxu1  ;;  %v985_v40 = vadd.f32 %v1801_v34, %v2068_v41  ;;  %v1017_v42 = vadd.f32 %v1833_v35, %v2068_v41 }
 0x127   :  { %v1802_v38 = vpop.f32.mrb[26].mxu0  ;;  %v1834_v39 = vpop.f32.mrb[26].mxu1  ;;  %v983_v47 = vadd.f32 %v2068_v41, %v598_v36  ;;  %v1015_v48 = vadd.f32 %v2068_v41, %v726_v37 }
 0x128   :  { %v986_v43 = vadd.f32 %v1802_v38, %v2068_v41  ;;  %v1018_v44 = vadd.f32 %v1834_v39, %v2068_v41  ;;  %v601_v45 = vpop.f32.mrb[27].mxu0  ;;  %v729_v46 = vpop.f32.mrb[27].mxu1 }
 0x129   :  { %v984_v49 = vadd.f32 %v2068_v41, %v601_v45  ;;  %v1016_v50 = vadd.f32 %v2068_v41, %v729_v46 }
 0x12a   :  { %v1596_v51 = vpack.c.bf16 %v986_v43, %v985_v40  ;;  %v1676_v52 = vpack.c.bf16 %v1018_v44, %v1017_v42 }
 0x12b   :  { %v1591_v53 = vpack.c.bf16 %v984_v49, %v983_v47  ;;  %v1671_v54 = vpack.c.bf16 %v1016_v50, %v1015_v48 }
 0x12c   :  { %1700 = vst [vmem:[#allocation3 + $0x68] sm:$0xff] %v1596_v51   ;;  %1716 = vst [vmem:[#allocation3 + $0xe8] sm:$0xff] %v1676_v52  }
 0x12d   :  { %1699 = vst [vmem:[#allocation3 + $0x60] sm:$0xff] %v1591_v53   ;;  %1715 = vst [vmem:[#allocation3 + $0xe0] sm:$0xff] %v1671_v54   ;;  %v1805_v55 = vpop.f32.mrb[28].mxu0  ;;  %v1837_v56 = vpop.f32.mrb[28].mxu1 }
 0x12e   :  { %v614_v57 = vpop.f32.mrb[29].mxu0  ;;  %v742_v58 = vpop.f32.mrb[29].mxu1  ;;  %v989_v61 = vadd.f32 %v1805_v55, %v2068_v41  ;;  %v1021_v62 = vadd.f32 %v1837_v56, %v2068_v41 }
 0x12f   :  { %v1806_v59 = vpop.f32.mrb[30].mxu0  ;;  %v1838_v60 = vpop.f32.mrb[30].mxu1  ;;  %v987_v3 = vadd.f32 %v2068_v41, %v614_v57  ;;  %v1019_v4 = vadd.f32 %v2068_v41, %v742_v58 }
 0x130   :  { %v990_v63 = vadd.f32 %v1806_v59, %v2068_v41  ;;  %v1022_v0 = vadd.f32 %v1838_v60, %v2068_v41  ;;  %v617_v1 = vpop.f32.mrb[31].mxu0  ;;  %v745_v2 = vpop.f32.mrb[31].mxu1 }
 0x131   :  { %v988_v5 = vadd.f32 %v2068_v41, %v617_v1  ;;  %v1020_v6 = vadd.f32 %v2068_v41, %v745_v2 }
 0x132   :  { %v1606_v7 = vpack.c.bf16 %v990_v63, %v989_v61  ;;  %v1686_v8 = vpack.c.bf16 %v1022_v0, %v1021_v62 }
 0x133   :  { %v1601_v9 = vpack.c.bf16 %v988_v5, %v987_v3  ;;  %v1681_v10 = vpack.c.bf16 %v1020_v6, %v1019_v4 }
 0x134   :  { %1702 = vst [vmem:[#allocation3 + $0x78] sm:$0xff] %v1606_v7   ;;  %1718 = vst [vmem:[#allocation3 + $0xf8] sm:$0xff] %v1686_v8  }
 0x135   :  { %1701 = vst [vmem:[#allocation3 + $0x70] sm:$0xff] %v1601_v9   ;;  %1717 = vst [vmem:[#allocation3 + $0xf0] sm:$0xff] %v1681_v10  }
 0x136   :  { %1909 = shalt.err (!%p1906_p4)
}
 0x137   :  { %s1910_s13 = scalar_lea.hbm %s2149_s3, 4096 }
 0x138   :  { %p1911_p5 = scmp.ne.s32.totalorder %s2149_s3, %s1910_s13  ;;  %p1914_p6 = scmp.lt.u32.totalorder %s1910_s13, %s2149_s3 }
 0x13a   :  { %p1916_p7 = pnand %p1914_p6, %p1911_p5 }
 0x13c   :  { %1919 = shalt.err (!%p1916_p7)
}
 0x13d   :  { %s1923_s18 = smov 64   ;;  %s1924_s19 = smov 4  }
 0x13e   :  { %1354 = dma.vmem_to_hbm [thread:$0]  %s1349_s2, 4096, %s2149_s3, [#allocation4], %s1923_s18, %s1923_s18, %s1924_s19  }
 0x13f   :  { %1920 = dma.done.wait [#allocation4], 4096  }
 0x140   :  { %1921 = vsyncadd [#allocation4], 4294963200 }
 0x141   :  { %1358 = vsyncpa [#allocation4], 1 }

</bundles_post_ra>
